<compile_context>
chip_gen: v7x
topology: tpu7x:2x2x1
jax: 0.10.0
libtpu: 0.0.40
codegen_flags: <defaults>
</compile_context>

<pallas_src>
import math
from functools import partial

import jax
import jax.numpy as jnp
from jax import lax
from jax.experimental import pallas as pl
from jax.experimental.pallas import tpu as pltpu

LN_EPS = 1e-5
_MIB = 1024 * 1024


def _round_up(x, m):
    return ((x + m - 1) // m) * m


def _gelu_exact(x):
    # PyTorch nn.GELU() default: 0.5 * x * (1 + erf(x / sqrt(2)))
    # TODO(synk): switch to tanh-approx (EUP-resident) only if exact-erf
    # semantics may be relaxed and VALU is measured as the binding slot.
    return 0.5 * x * (1.0 + lax.erf(x * (1.0 / math.sqrt(2.0))))


def _tpu_generation():
    try:
        kind = jax.devices()[0].device_kind.lower()
    except Exception:
        return 0
    for g in (7, 6, 5):
        if f"v{g}" in kind:
            return g
    return 0


def _hw_config():
    """Per-generation tiling and scoped-VMEM budget."""
    gen = _tpu_generation()
    if gen == 7:
        # 64 MiB VMEM/TC, ~1.6 TB/s effective HBM/TC -> trade hidden tile for
        # token tile (intensity ~ tm FLOP/B); leave compiler headroom in VMEM.
        cfg = dict(gen=7, token_tile=512, hidden_tile=256,
                   vmem_bytes=52 * _MIB, weight_buffers=None, x_buffers=1)
    elif gen == 6:
        # 128 MiB VMEM, ridge ~650 FLOP/B -> big token tile, big VMEM budget.
        cfg = dict(gen=6, token_tile=512, hidden_tile=512,
                   vmem_bytes=96 * _MIB, weight_buffers=None, x_buffers=None)
    elif gen == 5:
        # Compute-bound already at tm=256 -> spend VMEM on deeper weight
        # buffering instead of bigger tiles.
        cfg = dict(gen=5, token_tile=256, hidden_tile=512,
                   vmem_bytes=56 * _MIB, weight_buffers=3, x_buffers=None)
    else:
        cfg = dict(gen=0, token_tile=256, hidden_tile=512,
                   vmem_bytes=64 * _MIB, weight_buffers=None, x_buffers=None)
    # Never request more scoped VMEM than the chip physically has (headroom).
    try:
        cap = pltpu.get_tpu_info().vmem_capacity_bytes
        cfg["vmem_bytes"] = max(16 * _MIB, min(cfg["vmem_bytes"], cap - 8 * _MIB))
    except Exception:
        pass
    return cfg


def pack_mlp_params(params, *, hidden_tile=None, config=None):
    """One-time weight packing (pad, bf16 cast, per-tile W0||W1 interleave).

    Do this ONCE at init: repacking weights every forward call costs full HBM
    read+write passes over all three weight matrices (pure overhead).
    """
    cfg = dict(config or _hw_config())
    if hidden_tile is not None:
        cfg["hidden_tile"] = int(hidden_tile)

    f32, bf16 = jnp.float32, jnp.bfloat16
    D, H = params["w0"].shape
    Dp = _round_up(D, 128)

    # Choose th as a multiple of 128 that evenly divides round_up(H, 128):
    # no dead zero hidden columns, no Hp = round_up(H, th) blowup.
    Hp = _round_up(H, 128)
    th_req = max(128, (int(cfg["hidden_tile"]) // 128) * 128)
    th = 128
    for cand in range(min(th_req, Hp), 127, -128):
        if Hp % cand == 0:
            th = cand
            break
    n_h = Hp // th

    # LayerNorm affine (f32, zero-padded so padded lanes stay 0 after affine).
    gamma = jnp.pad(params["gamma"].astype(f32), ((0, 0), (0, Dp - D)))
    beta = jnp.pad(params["beta"].astype(f32), ((0, 0), (0, Dp - D)))

    # Fused W0 || W1, interleaved per hidden tile so each (Dp, 2*th) block is
    # contiguous: columns [w0 tile j | w1 tile j]. Weights in bf16.
    w0 = jnp.pad(params["w0"], ((0, Dp - D), (0, Hp - H))).astype(bf16)
    w1 = jnp.pad(params["w1"], ((0, Dp - D), (0, Hp - H))).astype(bf16)
    w01 = jnp.concatenate(
        [w0.reshape(Dp, n_h, th), w1.reshape(Dp, n_h, th)], axis=2
    ).reshape(Dp, 2 * Hp)

    b0 = jnp.pad(params["b0"].astype(f32), ((0, 0), (0, Hp - H)))
    b1 = jnp.pad(params["b1"].astype(f32), ((0, 0), (0, Hp - H)))
    b01 = jnp.concatenate(
        [b0.reshape(1, n_h, th), b1.reshape(1, n_h, th)], axis=2
    ).reshape(1, 2 * Hp)

    w2 = jnp.pad(params["w2"], ((0, Hp - H), (0, Dp - D))).astype(bf16)
    b2 = jnp.pad(params["b2"].astype(f32), ((0, 0), (0, Dp - D)))

    return {
        "gamma": gamma, "beta": beta,
        "w01": w01, "b01": b01, "w2": w2, "b2": b2,
        "geom": dict(D=int(D), H=int(H), Dp=int(Dp), Hp=int(Hp),
                     th=int(th), n_h=int(n_h)),
        "cfg": cfg,
    }


def mlp_block_kernel(x_ref, g_ref, b_ref, w01_ref, b01_ref, w2_ref, b2_ref,
                     o_ref, xn_ref, *, d_actual, th):
    """Grid = (token_tiles, hidden_tiles). Hidden axis is the reduction axis."""
    j = pl.program_id(1)
    n_h = pl.num_programs(1)

    # --- once per token tile: LayerNorm (f32 stats), cache bf16 xn, zero out ---
    @pl.when(j == 0)
    def _():
        x = x_ref[...].astype(jnp.float32)                      # [tm, Dp]
        d_padded = x.shape[-1]
        inv_d = 1.0 / d_actual
        mean = jnp.sum(x, axis=-1, keepdims=True) * inv_d       # padded lanes are 0
        xc = x - mean
        if d_padded != d_actual:                                # static branch
            mask = lax.broadcasted_iota(jnp.int32, (1, d_padded), 1) < d_actual
            xc = jnp.where(mask, xc, 0.0)
        var = jnp.sum(xc * xc, axis=-1, keepdims=True) * inv_d
        xn = xc * lax.rsqrt(var + LN_EPS)
        xn = xn * g_ref[...] + b_ref[...]                       # padded gamma/beta = 0
        xn_ref[...] = xn.astype(xn_ref.dtype)                   # bf16 cache
        # f32 output block is resident across j (block index (i, 0)) and
        # doubles as the accumulator -> no separate VMEM acc scratch.
        o_ref[...] = jnp.zeros_like(o_ref)

    # --- fused up-projection for this hidden tile: [tm, 2*th] in one matmul ---
    xn = xn_ref[...]                                            # bf16 [tm, Dp]
    h01 = jnp.dot(xn, w01_ref[...],
                  preferred_element_type=jnp.float32) + b01_ref[...]
    h0 = h01[:, :th]
    h1 = h01[:, th:]
    h = (_gelu_exact(h0) * h1).astype(jnp.bfloat16)             # [tm, th]

    # --- partial down-projection, accumulate into the resident output tile ---
    o_ref[...] += jnp.dot(h, w2_ref[...], preferred_element_type=jnp.float32)

    # --- finalize: bias add (store happens via normal output writeback) ---
    @pl.when(j == n_h - 1)
    def _():
        o_ref[...] += b2_ref[...]


def _spec(shape, index_map, buffers=None):
    if buffers is None:
        return pl.BlockSpec(shape, index_map)
    try:
        return pl.BlockSpec(shape, index_map, pipeline_mode=pl.Buffered(buffers))
    except TypeError:  # pipeline_mode unsupported -> default double-buffering
        return pl.BlockSpec(shape, index_map)


def mlp_block(x, packed, *, token_tile=None):
    """Hot path: only activation pad/reshape + pallas_call (weights pre-packed).

    x: [B, S, D] float32. packed: result of pack_mlp_params().
    """
    B, S, D = x.shape
    g = packed["geom"]
    cfg = packed["cfg"]
    assert D == g["D"], "input feature dim does not match packed params"
    Dp, Hp, th, n_h = g["Dp"], g["Hp"], g["th"], g["n_h"]

    T = B * S
    tm_req = int(token_tile if token_tile is not None else cfg["token_tile"])
    tm_req = max(8, (tm_req // 8) * 8)                 # clamp to sublane multiple
    Tp8 = _round_up(T, 8)
    tm = min(tm_req, Tp8)
    if cfg["gen"] == 7 and Tp8 >= 32:
        # Guarantee >=2 token tiles so the "parallel" axis can shard across
        # both v7x TensorCores (keep each tile >=16 rows).
        tm = min(tm, _round_up(max(16, Tp8 // 2), 8))
    Tp = _round_up(T, tm)
    n_t = Tp // tm

    # Tokens: flatten + zero-pad (the only per-call repacking left).
    x2d = jnp.pad(x.reshape(T, D), ((0, Tp - T), (0, Dp - D)))

    wbuf = cfg["weight_buffers"]
    xbuf = cfg["x_buffers"]

    kernel = partial(mlp_block_kernel, d_actual=D, th=th)

    cost = pl.CostEstimate(
        flops=int(6 * Tp * Dp * Hp),            # up-proj (2*Hp) + down-proj
        transcendentals=int(Tp * Hp),           # erf per hidden activation
        bytes_accessed=int(Tp * Dp * 8 + Dp * 2 * Hp * 2 + Hp * Dp * 2),
    )

    out2d = pl.pallas_call(
        kernel,
        out_shape=jax.ShapeDtypeStruct((Tp, Dp), jnp.float32),
        grid_spec=pltpu.PrefetchScalarGridSpec(
            num_scalar_prefetch=0,
            grid=(n_t, n_h),
            in_specs=[
                _spec((tm, Dp), lambda i, j: (i, 0), xbuf),       # x token tile
                pl.BlockSpec((1, Dp), lambda i, j: (0, 0)),       # gamma
                pl.BlockSpec((1, Dp), lambda i, j: (0, 0)),       # beta
                _spec((Dp, 2 * th), lambda i, j: (0, j), wbuf),   # W0||W1 tile
                pl.BlockSpec((1, 2 * th), lambda i, j: (0, j)),   # b0||b1 tile
                _spec((th, Dp), lambda i, j: (j, 0), wbuf),       # W2 tile
                pl.BlockSpec((1, Dp), lambda i, j: (0, 0)),       # b2
            ],
            out_specs=pl.BlockSpec((tm, Dp), lambda i, j: (i, 0)),
            scratch_shapes=[
                pltpu.VMEM((tm, Dp), jnp.bfloat16),   # cached normalized tokens
            ],
        ),
        compiler_params=pltpu.CompilerParams(
            dimension_semantics=("parallel", "arbitrary"),
            vmem_limit_bytes=int(cfg["vmem_bytes"]),
        ),
        cost_estimate=cost,
    )(x2d, packed["gamma"], packed["beta"], packed["w01"], packed["b01"],
      packed["w2"], packed["b2"])

    return out2d[:T, :D].reshape(B, S, D).astype(x.dtype)


def init_params(key, dim, hidden_dim):
    """Deterministic synthetic parameters matching MLPBlock.__init__ shapes."""
    ks = jax.random.split(key, 6)
    scale0 = 1.0 / math.sqrt(dim)
    scale2 = 1.0 / math.sqrt(hidden_dim)
    return {
        # LayerNorm(dim) affine params
        "gamma": jnp.ones((1, dim), jnp.float32),
        "beta": jnp.zeros((1, dim), jnp.float32),
        # Linear(dim, hidden_dim) stored as [in, out]
        "w0": jax.random.normal(ks[0], (dim, hidden_dim), jnp.float32) * scale0,
        "b0": jax.random.normal(ks[1], (1, hidden_dim), jnp.float32) * 0.01,
        "w1": jax.random.normal(ks[2], (dim, hidden_dim), jnp.float32) * scale0,
        "b1": jax.random.normal(ks[3], (1, hidden_dim), jnp.float32) * 0.01,
        # Linear(hidden_dim, dim)
        "w2": jax.random.normal(ks[4], (hidden_dim, dim), jnp.float32) * scale2,
        "b2": jax.random.normal(ks[5], (1, dim), jnp.float32) * 0.01,
    }


def mlp_block_ref(x, params, *, matmul_dtype=jnp.float32):
    """Pure-JAX reference. matmul_dtype=bf16 mirrors the kernel's precision."""
    f32 = jnp.float32
    mean = jnp.mean(x, axis=-1, keepdims=True)
    var = jnp.mean((x - mean) ** 2, axis=-1, keepdims=True)
    xn = (x - mean) * lax.rsqrt(var + LN_EPS)
    xn = xn * params["gamma"][0] + params["beta"][0]
    xm = xn.astype(matmul_dtype)
    h0 = jnp.dot(xm, params["w0"].astype(matmul_dtype),
                 preferred_element_type=f32) + params["b0"][0]
    h1 = jnp.dot(xm, params["w1"].astype(matmul_dtype),
                 preferred_element_type=f32) + params["b1"][0]
    h = (_gelu_exact(h0) * h1).astype(matmul_dtype)
    out = jnp.dot(h, params["w2"].astype(matmul_dtype),
                  preferred_element_type=f32) + params["b2"][0]
    return out.astype(x.dtype)


if __name__ == "__main__":
    # Small shapes implied by the module: x is [batch, seq, dim]
    B, S, DIM, HIDDEN = 2, 8, 32, 64

    key = jax.random.PRNGKey(0)
    kx, kp = jax.random.split(key)
    x = jax.random.normal(kx, (B, S, DIM), jnp.float32)
    params = init_params(kp, DIM, HIDDEN)

    # One-time weight packing (outside the hot path).
    packed = pack_mlp_params(params)

    out = mlp_block(x, packed)
    out = jax.block_until_ready(out)
    assert out.shape == (B, S, DIM)

    # Tight check vs. a reference using the same bf16-operand / f32-accum math.
    ref_bf16 = mlp_block_ref(x, params, matmul_dtype=jnp.bfloat16)
    assert jnp.allclose(out, ref_bf16, atol=2e-3, rtol=2e-3), \
        "mismatch vs bf16-math reference"

    # Loose check vs. the exact f32 PyTorch-semantics reference (bf16 rounding).
    ref_f32 = mlp_block_ref(x, params, matmul_dtype=jnp.float32)
    assert jnp.allclose(out, ref_f32, atol=5e-2, rtol=5e-2), \
        "mismatch vs f32 reference"

    print("KERNEL_OK")
</pallas_src>

<mosaic_0001>
module attributes {stable_mosaic.version = 11 : i64} {
  func.func @mlp_block_kernel(%arg0: i32, %arg1: i32, %arg2: memref<16x128xf32, #tpu.memory_space<vmem>>, %arg3: memref<1x128xf32, #tpu.memory_space<vmem>>, %arg4: memref<1x128xf32, #tpu.memory_space<vmem>>, %arg5: memref<128x256xbf16, #tpu.memory_space<vmem>>, %arg6: memref<1x256xf32, #tpu.memory_space<vmem>>, %arg7: memref<128x128xbf16, #tpu.memory_space<vmem>>, %arg8: memref<1x128xf32, #tpu.memory_space<vmem>>, %arg9: memref<16x128xf32, #tpu.memory_space<vmem>>, %arg10: memref<16x128xbf16, #tpu.memory_space<vmem>>) attributes {dimension_semantics = [#tpu.dimension_semantics<parallel>, #tpu.dimension_semantics<arbitrary>], iteration_bounds = array<i64: 1, 1>, scalar_prefetch = 0 : i64, scratch_operands = 1 : i64, tpu.core_type = #tpu.core_type<tc>, window_params = [{transform_indices = @transform_0, window_bounds = array<i64: 16, 128>}, {pipeline_mode = #tpu.pipeline_mode<synchronous>, transform_indices = @transform_1, window_bounds = array<i64: 1, 128>}, {pipeline_mode = #tpu.pipeline_mode<synchronous>, transform_indices = @transform_2, window_bounds = array<i64: 1, 128>}, {transform_indices = @transform_3, window_bounds = array<i64: 128, 256>}, {transform_indices = @transform_4, window_bounds = array<i64: 1, 256>}, {transform_indices = @transform_5, window_bounds = array<i64: 128, 128>}, {pipeline_mode = #tpu.pipeline_mode<synchronous>, transform_indices = @transform_6, window_bounds = array<i64: 1, 128>}, {transform_indices = @transform_7, window_bounds = array<i64: 16, 128>}]} {
    %c0_i32 = arith.constant 0 : i32
    %0 = arith.cmpi eq, %arg1, %c0_i32 : i32
    %1 = arith.extui %0 : i1 to i32
    %c0_i32_0 = arith.constant 0 : i32
    %2 = arith.cmpi ne, %1, %c0_i32_0 : i32
    scf.if %2 {
      %c0_18 = arith.constant 0 : index
      %c0_19 = arith.constant 0 : index
      %29 = vector.load %arg2[%c0_18, %c0_19] : memref<16x128xf32, #tpu.memory_space<vmem>>, vector<16x128xf32>
      %cst_20 = arith.constant dense<0.000000e+00> : vector<16xf32>
      %30 = vector.multi_reduction <add>, %29, %cst_20 [1] : vector<16x128xf32> to vector<16xf32>
      %31 = vector.shape_cast %30 : vector<16xf32> to vector<16x1xf32>
      %cst_21 = arith.constant 3.125000e-02 : f32
      %32 = vector.broadcast %cst_21 : f32 to vector<16x1xf32>
      %33 = arith.mulf %31, %32 : vector<16x1xf32>
      %34 = vector.broadcast %33 : vector<16x1xf32> to vector<16x128xf32>
      %35 = arith.subf %29, %34 : vector<16x128xf32>
      %36 = tpu.iota {dimensions = array<i32: 1>} : vector<1x128xi32>
      %c32_i32 = arith.constant 32 : i32
      %37 = vector.broadcast %c32_i32 : i32 to vector<1x128xi32>
      %38 = arith.cmpi slt, %36, %37 : vector<1x128xi32>
      %cst_22 = arith.constant 0.000000e+00 : f32
      %39 = vector.shape_cast %38 : vector<1x128xi1> to vector<1x128xi1>
      %40 = vector.broadcast %39 : vector<1x128xi1> to vector<16x128xi1>
      %41 = vector.broadcast %cst_22 : f32 to vector<16x128xf32>
      %42 = arith.select %40, %35, %41 : vector<16x128xi1>, vector<16x128xf32>
      %43 = arith.mulf %42, %42 : vector<16x128xf32>
      %cst_23 = arith.constant dense<0.000000e+00> : vector<16xf32>
      %44 = vector.multi_reduction <add>, %43, %cst_23 [1] : vector<16x128xf32> to vector<16xf32>
      %45 = vector.shape_cast %44 : vector<16xf32> to vector<16x1xf32>
      %cst_24 = arith.constant 3.125000e-02 : f32
      %46 = vector.broadcast %cst_24 : f32 to vector<16x1xf32>
      %47 = arith.mulf %45, %46 : vector<16x1xf32>
      %cst_25 = arith.constant 9.99999974E-6 : f32
      %48 = vector.broadcast %cst_25 : f32 to vector<16x1xf32>
      %49 = arith.addf %47, %48 : vector<16x1xf32>
      %50 = math.rsqrt %49 : vector<16x1xf32>
      %51 = vector.broadcast %50 : vector<16x1xf32> to vector<16x128xf32>
      %52 = arith.mulf %42, %51 : vector<16x128xf32>
      %c0_26 = arith.constant 0 : index
      %c0_27 = arith.constant 0 : index
      %53 = vector.load %arg3[%c0_26, %c0_27] : memref<1x128xf32, #tpu.memory_space<vmem>>, vector<1x128xf32>
      %54 = vector.broadcast %53 : vector<1x128xf32> to vector<16x128xf32>
      %55 = arith.mulf %52, %54 : vector<16x128xf32>
      %c0_28 = arith.constant 0 : index
      %c0_29 = arith.constant 0 : index
      %56 = vector.load %arg4[%c0_28, %c0_29] : memref<1x128xf32, #tpu.memory_space<vmem>>, vector<1x128xf32>
      %57 = vector.broadcast %56 : vector<1x128xf32> to vector<16x128xf32>
      %58 = arith.addf %55, %57 : vector<16x128xf32>
      %59 = arith.truncf %58 : vector<16x128xf32> to vector<16x128xbf16>
      %c0_30 = arith.constant 0 : index
      %c0_31 = arith.constant 0 : index
      %60 = vector.load %arg10[%c0_30, %c0_31] : memref<16x128xbf16, #tpu.memory_space<vmem>>, vector<16x128xbf16>
      tpu.vector_store %arg10[%c0_30, %c0_31], %59 {strides = array<i32>} : memref<16x128xbf16, #tpu.memory_space<vmem>>, vector<16x128xbf16>,
      %cst_32 = arith.constant 0.000000e+00 : f32
      %61 = vector.broadcast %cst_32 : f32 to vector<16x128xf32>
      %c0_33 = arith.constant 0 : index
      %c0_34 = arith.constant 0 : index
      %62 = vector.load %arg9[%c0_33, %c0_34] : memref<16x128xf32, #tpu.memory_space<vmem>>, vector<16x128xf32>
      tpu.vector_store %arg9[%c0_33, %c0_34], %61 {strides = array<i32>} : memref<16x128xf32, #tpu.memory_space<vmem>>, vector<16x128xf32>,
    } else {
    }
    %c0 = arith.constant 0 : index
    %c0_1 = arith.constant 0 : index
    %3 = vector.load %arg10[%c0, %c0_1] : memref<16x128xbf16, #tpu.memory_space<vmem>>, vector<16x128xbf16>
    %c0_2 = arith.constant 0 : index
    %c0_3 = arith.constant 0 : index
    %4 = vector.load %arg5[%c0_2, %c0_3] : memref<128x256xbf16, #tpu.memory_space<vmem>>, vector<128x256xbf16>
    %cst = arith.constant dense<0.000000e+00> : vector<16x256xf32>
    %5 = tpu.matmul %3, %4, %cst {dimension_numbers = #tpu.dot_dimension_numbers<[1], [0], [0], [1], [0, 0, 1, 1], [], []>} : vector<16x128xbf16>, vector<128x256xbf16>, vector<16x256xf32> -> vector<16x256xf32>
    %c0_4 = arith.constant 0 : index
    %c0_5 = arith.constant 0 : index
    %6 = vector.load %arg6[%c0_4, %c0_5] : memref<1x256xf32, #tpu.memory_space<vmem>>, vector<1x256xf32>
    %7 = vector.broadcast %6 : vector<1x256xf32> to vector<16x256xf32>
    %8 = arith.addf %5, %7 : vector<16x256xf32>
    %9 = vector.extract_strided_slice %8 {offsets = [0, 0], sizes = [16, 128], strides = [1, 1]} : vector<16x256xf32> to vector<16x128xf32>
    %10 = vector.extract_strided_slice %8 {offsets = [0, 128], sizes = [16, 128], strides = [1, 1]} : vector<16x256xf32> to vector<16x128xf32>
    %cst_6 = arith.constant 5.000000e-01 : f32
    %11 = vector.broadcast %cst_6 : f32 to vector<16x128xf32>
    %12 = arith.mulf %11, %9 : vector<16x128xf32>
    %cst_7 = arith.constant 0.707106769 : f32
    %13 = vector.broadcast %cst_7 : f32 to vector<16x128xf32>
    %14 = arith.mulf %9, %13 : vector<16x128xf32>
    %15 = math.erf %14 : vector<16x128xf32>
    %cst_8 = arith.constant 1.000000e+00 : f32
    %16 = vector.broadcast %cst_8 : f32 to vector<16x128xf32>
    %17 = arith.addf %16, %15 : vector<16x128xf32>
    %18 = arith.mulf %12, %17 : vector<16x128xf32>
    %19 = arith.mulf %18, %10 : vector<16x128xf32>
    %20 = arith.truncf %19 : vector<16x128xf32> to vector<16x128xbf16>
    %c0_9 = arith.constant 0 : index
    %c0_10 = arith.constant 0 : index
    %21 = vector.load %arg9[%c0_9, %c0_10] : memref<16x128xf32, #tpu.memory_space<vmem>>, vector<16x128xf32>
    %c0_11 = arith.constant 0 : index
    %c0_12 = arith.constant 0 : index
    %22 = vector.load %arg7[%c0_11, %c0_12] : memref<128x128xbf16, #tpu.memory_space<vmem>>, vector<128x128xbf16>
    %cst_13 = arith.constant dense<0.000000e+00> : vector<16x128xf32>
    %23 = tpu.matmul %20, %22, %cst_13 {dimension_numbers = #tpu.dot_dimension_numbers<[1], [0], [0], [1], [0, 0, 1, 1], [], []>} : vector<16x128xbf16>, vector<128x128xbf16>, vector<16x128xf32> -> vector<16x128xf32>
    %24 = arith.addf %21, %23 : vector<16x128xf32>
    %c0_14 = arith.constant 0 : index
    %c0_15 = arith.constant 0 : index
    %25 = vector.load %arg9[%c0_14, %c0_15] : memref<16x128xf32, #tpu.memory_space<vmem>>, vector<16x128xf32>
    tpu.vector_store %arg9[%c0_14, %c0_15], %24 {strides = array<i32>} : memref<16x128xf32, #tpu.memory_space<vmem>>, vector<16x128xf32>,
    %c0_i32_16 = arith.constant 0 : i32
    %26 = arith.cmpi eq, %arg1, %c0_i32_16 : i32
    %27 = arith.extui %26 : i1 to i32
    %c0_i32_17 = arith.constant 0 : i32
    %28 = arith.cmpi ne, %27, %c0_i32_17 : i32
    scf.if %28 {
      %c0_18 = arith.constant 0 : index
      %c0_19 = arith.constant 0 : index
      %29 = vector.load %arg9[%c0_18, %c0_19] : memref<16x128xf32, #tpu.memory_space<vmem>>, vector<16x128xf32>
      %c0_20 = arith.constant 0 : index
      %c0_21 = arith.constant 0 : index
      %30 = vector.load %arg8[%c0_20, %c0_21] : memref<1x128xf32, #tpu.memory_space<vmem>>, vector<1x128xf32>
      %31 = vector.broadcast %30 : vector<1x128xf32> to vector<16x128xf32>
      %32 = arith.addf %29, %31 : vector<16x128xf32>
      %c0_22 = arith.constant 0 : index
      %c0_23 = arith.constant 0 : index
      %33 = vector.load %arg9[%c0_22, %c0_23] : memref<16x128xf32, #tpu.memory_space<vmem>>, vector<16x128xf32>
      tpu.vector_store %arg9[%c0_22, %c0_23], %32 {strides = array<i32>} : memref<16x128xf32, #tpu.memory_space<vmem>>, vector<16x128xf32>,
    } else {
    }
    return
  }
  func.func @transform_0(%arg0: i32, %arg1: i32) -> (i32, i32) {
    %c0_i32 = arith.constant 0 : i32
    %c0_i32_0 = arith.constant 0 : i32
    return %arg0, %c0_i32 : i32, i32
  }
  func.func @transform_1(%arg0: i32, %arg1: i32) -> (i32, i32) {
    %c0_i32 = arith.constant 0 : i32
    %c0_i32_0 = arith.constant 0 : i32
    %c0_i32_1 = arith.constant 0 : i32
    return %c0_i32, %c0_i32_0 : i32, i32
  }
  func.func @transform_2(%arg0: i32, %arg1: i32) -> (i32, i32) {
    %c0_i32 = arith.constant 0 : i32
    %c0_i32_0 = arith.constant 0 : i32
    %c0_i32_1 = arith.constant 0 : i32
    return %c0_i32, %c0_i32_0 : i32, i32
  }
  func.func @transform_3(%arg0: i32, %arg1: i32) -> (i32, i32) {
    %c0_i32 = arith.constant 0 : i32
    %c0_i32_0 = arith.constant 0 : i32
    return %c0_i32, %arg1 : i32, i32
  }
  func.func @transform_4(%arg0: i32, %arg1: i32) -> (i32, i32) {
    %c0_i32 = arith.constant 0 : i32
    %c0_i32_0 = arith.constant 0 : i32
    return %c0_i32, %arg1 : i32, i32
  }
  func.func @transform_5(%arg0: i32, %arg1: i32) -> (i32, i32) {
    %c0_i32 = arith.constant 0 : i32
    %c0_i32_0 = arith.constant 0 : i32
    return %arg1, %c0_i32 : i32, i32
  }
  func.func @transform_6(%arg0: i32, %arg1: i32) -> (i32, i32) {
    %c0_i32 = arith.constant 0 : i32
    %c0_i32_0 = arith.constant 0 : i32
    %c0_i32_1 = arith.constant 0 : i32
    return %c0_i32, %c0_i32_0 : i32, i32
  }
  func.func @transform_7(%arg0: i32, %arg1: i32) -> (i32, i32) {
    %c0_i32 = arith.constant 0 : i32
    %c0_i32_0 = arith.constant 0 : i32
    return %arg0, %c0_i32 : i32, i32
  }
}

</mosaic_0001>

<bundles_post_ra>
// kernel: tpu_custom_call.1
= control target key start
LH: loop header
LB: loop body
LE: loop exit
PB: predicated region body
PF: predicated region fallthrough
CT: control target
= control target key end

     0   :  { %12 = vsyncpa [#allocation4], 0  ;;  %s943_s0 = inlined_call_operand.hbm [shape: f32[16,128], index: 0, kind: input, shape index: {}]   ;;  %s944_s1 = inlined_call_operand.hbm [shape: f32[1,128], index: 1, kind: input, shape index: {}]   ;;  %s945_s2 = inlined_call_operand.hbm [shape: f32[1,128], index: 2, kind: input, shape index: {}]   ;;  %s946_s3 = inlined_call_operand.hbm [shape: bf16[128,256], index: 3, kind: input, shape index: {}]   ;;  %s947_s4 = inlined_call_operand.hbm [shape: f32[1,256], index: 4, kind: input, shape index: {}]   ;;  %s948_s5 = inlined_call_operand.hbm [shape: bf16[128,128], index: 5, kind: input, shape index: {}]   ;;  %s949_s6 = inlined_call_operand.hbm [shape: f32[1,128], index: 6, kind: input, shape index: {}]   ;;  %s950_s7 = inlined_call_operand.hbm [shape: f32[16,128], index: 7, kind: output, shape index: {}]  }
   0x1   :  { %13 = vsyncpa [#allocation7], 0 }
   0x2   :  { %14 = vsyncpa [#allocation10], 0 }
   0x3   :  { %15 = vsyncpa [#allocation13], 0 }
   0x4   :  { %16 = vsyncpa [#allocation5], 0  ;;  %s781_s24 = smov [#allocation6]   ;;  %s595_s28 = scalar_lea.hbm %s944_s1, 16 }
   0x5   :  { %s35_s25 = sshll.u32 %s781_s24, 4  ;;  %p596_p0 = scmp.ne.s32.totalorder %s944_s1, %s595_s28  ;;  %s36_s25 = int_to_ptr.vmem [resolvable:$true] %s35_s25 }
   0x6   :  { %p599_p1 = scmp.lt.u32.totalorder %s595_s28, %s944_s1 }
   0x8   :  { %p601_p2 = pnand %p599_p1, %p596_p0 }
   0xa   :  { %604 = shalt.err (!%p601_p2)
}
   0xb   :  { %s605_s10 = scalar_lea.vmem %s36_s25, 16  ;;  %s609_s11 = scalar_lea.vmem %s36_s25, 32 }
   0xc   :  { %p606_p3 = scmp.ne.s32.totalorder %s36_s25, %s605_s10  ;;  %p610_p4 = scmp.lt.s32.totalorder %s36_s25, %s36_s25 }
   0xd   :  { %p611_p5 = scmp.lt.s32.totalorder %s609_s11, %s605_s10 }
   0xf   :  { %p612_p6 = por %p611_p5, %p610_p4 }
  0x11   :  { %p613_p7 = pnand %p612_p6, %p606_p3 }
  0x13   :  { %616 = shalt.err (!%p613_p7)
}
  0x14   :  { %38 = dma.hbm_to_vmem [thread:$0]  %s944_s1, 16, %s36_s25, [#allocation7]  }
  0x15   :  { %s782_s14 = smov [#allocation9]   ;;  %s783_s16 = smov [#allocation12]  }
  0x16   :  { %s54_s15 = sshll.u32 %s782_s14, 4  ;;  %s76_s17 = sshll.u32 %s783_s16, 4  ;;  %s55_s15 = int_to_ptr.vmem [resolvable:$true] %s54_s15  ;;  %s77_s17 = int_to_ptr.vmem [resolvable:$true] %s76_s17 }
  0x17   :  { %s617_s20 = scalar_lea.hbm %s946_s3, 2048 }
  0x18   :  { %p618_p8 = scmp.ne.s32.totalorder %s946_s3, %s617_s20  ;;  %p621_p9 = scmp.lt.u32.totalorder %s617_s20, %s946_s3 }
  0x1a   :  { %p623_p10 = pnand %p621_p9, %p618_p8 }
  0x1c   :  { %626 = shalt.err (!%p623_p10)
}
  0x1d   :  { %s627_s1 = scalar_lea.vmem %s55_s15, 2048  ;;  %p632_p12 = scmp.lt.s32.totalorder %s55_s15, %s55_s15 }
  0x1e   :  { %p628_p11 = scmp.ne.s32.totalorder %s55_s15, %s627_s1  ;;  %p633_p13 = scmp.lt.s32.totalorder %s627_s1, %s627_s1 }
  0x20   :  { %p634_p0 = por %p633_p13, %p632_p12 }
  0x22   :  { %p635_p1 = pnand %p634_p0, %p628_p11 }
  0x24   :  { %638 = shalt.err (!%p635_p1)
}
  0x25   :  { %s784_s25 = smov 128   ;;  %s785_s26 = smov 8  }
  0x26   :  { %60 = dma.hbm_to_vmem [thread:$0]  %s946_s3, 2048, %s55_s15, [#allocation10], %s784_s25, %s784_s25, %s785_s26  }
  0x27   :  { %s639_s8 = scalar_lea.hbm %s948_s5, 1024 }
  0x28   :  { %p640_p2 = scmp.ne.s32.totalorder %s948_s5, %s639_s8  ;;  %p643_p3 = scmp.lt.u32.totalorder %s639_s8, %s948_s5 }
  0x2a   :  { %p645_p4 = pnand %p643_p3, %p640_p2 }
  0x2c   :  { %648 = shalt.err (!%p645_p4)
}
  0x2d   :  { %s649_s13 = scalar_lea.vmem %s77_s17, 1024  ;;  %p654_p6 = scmp.lt.s32.totalorder %s77_s17, %s77_s17 }
  0x2e   :  { %p650_p5 = scmp.ne.s32.totalorder %s77_s17, %s649_s13  ;;  %p655_p7 = scmp.lt.s32.totalorder %s649_s13, %s649_s13 }
  0x30   :  { %p656_p8 = por %p655_p7, %p654_p6 }
  0x32   :  { %p657_p9 = pnand %p656_p8, %p650_p5 }
  0x34   :  { %660 = shalt.err (!%p657_p9)
}
  0x35   :  { %s786_s3 = smov 64   ;;  %s787_s14 = smov 4  }
  0x36   :  { %82 = dma.hbm_to_vmem [thread:$0]  %s948_s5, 1024, %s77_s17, [#allocation13], %s786_s3, %s786_s3, %s787_s14  }
  0x37   :  { %s788_s18 = smov [#allocation3]   ;;  %s789_s20 = smov [#allocation8]  }
  0x38   :  { %s22_s19 = sshll.u32 %s788_s18, 4  ;;  %s45_s21 = sshll.u32 %s789_s20, 4  ;;  %s23_s19 = int_to_ptr.vmem [resolvable:$true] %s22_s19  ;;  %s46_s21 = int_to_ptr.vmem [resolvable:$true] %s45_s21 }
  0x39   :  { %s661_s24 = scalar_lea.hbm %s943_s0, 256 }
  0x3a   :  { %p662_p10 = scmp.ne.s32.totalorder %s943_s0, %s661_s24  ;;  %p665_p11 = scmp.lt.u32.totalorder %s661_s24, %s943_s0 }
  0x3c   :  { %p667_p12 = pnand %p665_p11, %p662_p10 }
  0x3e   :  { %670 = shalt.err (!%p667_p12)
}
  0x3f   :  { %s671_s5 = scalar_lea.vmem %s23_s19, 256  ;;  %p676_p0 = scmp.lt.s32.totalorder %s23_s19, %s23_s19 }
  0x40   :  { %p672_p13 = scmp.ne.s32.totalorder %s23_s19, %s671_s5  ;;  %p677_p1 = scmp.lt.s32.totalorder %s671_s5, %s671_s5 }
  0x42   :  { %p678_p2 = por %p677_p1, %p676_p0 }
  0x44   :  { %p679_p3 = pnand %p678_p2, %p672_p13 }
  0x46   :  { %682 = shalt.err (!%p679_p3)
}
  0x47   :  { %28 = dma.hbm_to_vmem [thread:$0]  %s943_s0, 256, %s23_s19, [#allocation4], %s784_s25, %s784_s25, %s785_s26  }
  0x48   :  { %s683_s10 = scalar_lea.hbm %s945_s2, 16 }
  0x49   :  { %p684_p4 = scmp.ne.s32.totalorder %s945_s2, %s683_s10  ;;  %p687_p5 = scmp.lt.u32.totalorder %s683_s10, %s945_s2 }
  0x4b   :  { %p689_p6 = pnand %p687_p5, %p684_p4 }
  0x4d   :  { %692 = shalt.err (!%p689_p6)
}
  0x4e   :  { %s693_s14 = scalar_lea.vmem %s46_s21, 16  ;;  %s697_s15 = scalar_lea.vmem %s46_s21, 32 }
  0x4f   :  { %p694_p7 = scmp.ne.s32.totalorder %s46_s21, %s693_s14  ;;  %p698_p8 = scmp.lt.s32.totalorder %s46_s21, %s46_s21 }
  0x50   :  { %p699_p9 = scmp.lt.s32.totalorder %s697_s15, %s693_s14 }
  0x52   :  { %p700_p10 = por %p699_p9, %p698_p8 }
  0x54   :  { %p701_p11 = pnand %p700_p10, %p694_p7 }
  0x56   :  { %704 = shalt.err (!%p701_p11)
}
  0x57   :  { %48 = dma.hbm_to_vmem [thread:$0]  %s945_s2, 16, %s46_s21, [#allocation7]  }
  0x58   :  { %s790_s18 = smov [#allocation11]   ;;  %s791_s20 = smov [#allocation14]  }
  0x59   :  { %s67_s19 = sshll.u32 %s790_s18, 4  ;;  %s89_s22 = sshll.u32 %s791_s20, 4  ;;  %s68_s19 = int_to_ptr.vmem [resolvable:$true] %s67_s19  ;;  %s90_s22 = int_to_ptr.vmem [resolvable:$true] %s89_s22 }
  0x5a   :  { %s705_s1 = scalar_lea.hbm %s947_s4, 32 }
  0x5b   :  { %p706_p12 = scmp.ne.s32.totalorder %s947_s4, %s705_s1  ;;  %p709_p13 = scmp.lt.u32.totalorder %s705_s1, %s947_s4 }
  0x5d   :  { %p711_p0 = pnand %p709_p13, %p706_p12 }
  0x5f   :  { %714 = shalt.err (!%p711_p0)
}
  0x60   :  { %s715_s2 = scalar_lea.vmem %s68_s19, 32  ;;  %p720_p2 = scmp.lt.s32.totalorder %s68_s19, %s68_s19 }
  0x61   :  { %p716_p1 = scmp.ne.s32.totalorder %s68_s19, %s715_s2  ;;  %p721_p3 = scmp.lt.s32.totalorder %s715_s2, %s715_s2 }
  0x63   :  { %p722_p4 = por %p721_p3, %p720_p2 }
  0x65   :  { %p723_p5 = pnand %p722_p4, %p716_p1 }
  0x67   :  { %726 = shalt.err (!%p723_p5)
}
  0x68   :  { %70 = dma.hbm_to_vmem [thread:$0]  %s947_s4, 32, %s68_s19, [#allocation10]  }
  0x69   :  { %s727_s9 = scalar_lea.hbm %s949_s6, 16 }
  0x6a   :  { %p728_p6 = scmp.ne.s32.totalorder %s949_s6, %s727_s9  ;;  %p731_p7 = scmp.lt.u32.totalorder %s727_s9, %s949_s6 }
  0x6c   :  { %p733_p8 = pnand %p731_p7, %p728_p6 }
  0x6e   :  { %736 = shalt.err (!%p733_p8)
}
  0x6f   :  { %s737_s3 = scalar_lea.vmem %s90_s22, 16  ;;  %s741_s14 = scalar_lea.vmem %s90_s22, 32 }
  0x70   :  { %p738_p9 = scmp.ne.s32.totalorder %s90_s22, %s737_s3  ;;  %p742_p10 = scmp.lt.s32.totalorder %s90_s22, %s90_s22 }
  0x71   :  { %p743_p11 = scmp.lt.s32.totalorder %s741_s14, %s737_s3 }
  0x73   :  { %p744_p12 = por %p743_p11, %p742_p10 }
  0x75   :  { %p745_p13 = pnand %p744_p12, %p738_p9 }
  0x77   :  { %748 = shalt.err (!%p745_p13)
}
  0x78   :  { %92 = dma.hbm_to_vmem [thread:$0]  %s949_s6, 16, %s90_s22, [#allocation13]  }
  0x79   :  { %771 = dma.done.wait [#allocation4], 256  }
  0x7a   :  { %772 = vsyncadd [#allocation4], 4294967040 }
  0x7b   :  { %773 = dma.done.wait [#allocation7], 32  }
  0x7c   :  { %774 = vsyncadd [#allocation7], 4294967264 }
  0x7d   :  { %775 = dma.done.wait [#allocation10], 2080  }
  0x7e   :  { %776 = vsyncadd [#allocation10], 4294965216 }
  0x7f   :  { %777 = dma.done.wait [#allocation13], 1040  }
  0x80   :  { %778 = vsyncadd [#allocation13], 4294966256  ;;  %v119_v0 = vld [vmem:[#allocation3] sm:$0xff]  ;;  %v120_v1 = vld [vmem:[#allocation3 + $0x8] sm:$0xff]  ;;  %v129_v5 = vlaneseq  ;;  %v792_v25 = vmov 0   ;;  %v793_v32 = vmov 0.0  }
  0x81   :  { %121 = vadd.xlane.f32.xlu0 %v119_v0  ;;  %v555_v2 = vld [vmem:[#allocation9 + $0x4] ss:$8 sps:$4 sm:$0xff]   ;;  %v557_v3 = vld [vmem:[#allocation9] ss:$8 sps:$4 sm:$0xff]   ;;  %v558_v4 = vld [vmem:[#allocation9 + $0x14] ss:$8 sps:$4 sm:$0xff]   ;;  %313 = vmatprep.mubr.bf16.mxu0 %v792_v25 }
  0x82   :  { %281 = vmatprep.subr.bf16.mxu0 %v555_v2  ;;  %v130_v6 = vand.u32 127, %v129_v5  ;;  %v560_v17 = vld [vmem:[#allocation9 + $0x10] ss:$8 sps:$4 sm:$0xff]   ;;  %v561_v18 = vld [vmem:[#allocation9 + $0x24] ss:$8 sps:$4 sm:$0xff]   ;;  %520 = vmatprep.subr.bf16.mxu1 %v793_v32  ;;  %vm794_vm1 = vmmov 0  }
  0x83   :  { %282 = vmatpush1.bf16.msra.mxu0 %v557_v3  ;;  %v563_v19 = vld [vmem:[#allocation9 + $0x20] ss:$8 sps:$4 sm:$0xff]   ;;  %v564_v20 = vld [vmem:[#allocation9 + $0x34] ss:$8 sps:$4 sm:$0xff]   ;;  %v566_v21 = vld [vmem:[#allocation9 + $0x30] ss:$8 sps:$4 sm:$0xff]   ;;  %536 = vmatprep.mubr.msk.bf16.mxu1 %vm794_vm1, %v793_v32 }
  0x84   :  { %283 = vmatprep.subr.bf16.mxu0 %v558_v4  ;;  %vm131_vm0 = vcmp.lt.s32.totalorder %v130_v6, 32  ;;  %v567_v22 = vld [vmem:[#allocation9 + $0x44] ss:$8 sps:$4 sm:$0xff]   ;;  %v569_v23 = vld [vmem:[#allocation9 + $0x40] ss:$8 sps:$4 sm:$0xff]   ;;  %v581_v51 = vld [vmem:[#allocation12 + $0x10] sm:$0xff]  }
  0x85   :  { %123 = vadd.xlane.f32.xlu0 %v120_v1  ;;  %v570_v24 = vld [vmem:[#allocation9 + $0x54] ss:$8 sps:$4 sm:$0xff]   ;;  %v572_v26 = vld [vmem:[#allocation9 + $0x50] ss:$8 sps:$4 sm:$0xff]   ;;  %v573_v27 = vld [vmem:[#allocation9 + $0x64] ss:$8 sps:$4 sm:$0xff]  }
  0x86   :  { %v575_v28 = vld [vmem:[#allocation9 + $0x60] ss:$8 sps:$4 sm:$0xff]   ;;  %v576_v29 = vld [vmem:[#allocation9 + $0x74] ss:$8 sps:$4 sm:$0xff]   ;;  %v578_v30 = vld [vmem:[#allocation9 + $0x70] ss:$8 sps:$4 sm:$0xff]  }
  0x87   :  { %284 = vmatpush1.bf16.msra.mxu0 %v560_v17  ;;  %v579_v31 = vld [vmem:[#allocation12] sm:$0xff]   ;;  %v580_v33 = vld [vmem:[#allocation12 + $0x8] sm:$0xff]   ;;  %v484_v42 = vld [vmem:[#allocation6] ss:$0 sm:$0xff]  ;;  %v192_v57 = vshrl.u32 %v129_v5, 7  ;;  %s795_s6 = smov [#allocation15]  }
  0x88   :  { %285 = vmatprep.subr.bf16.mxu0 %v561_v18  ;;  %521 = vmatpush3.bf16.msra.mxu1 %v579_v31  ;;  %v485_v46 = vld [vmem:[#allocation8] ss:$0 sm:$0xff]  ;;  %v583_v53 = vld [vmem:[#allocation12 + $0x20] sm:$0xff]   ;;  %v584_v54 = vld [vmem:[#allocation12 + $0x28] sm:$0xff]   ;;  %s469_s0 = sshll.u32 %s795_s6, 4  ;;  %s470_s0 = int_to_ptr.vmem [resolvable:$true] %s469_s0 }
  0x89   :  { %522 = vmatprep.subr.bf16.mxu1 %v793_v32  ;;  %v582_v52 = vld [vmem:[#allocation12 + $0x18] sm:$0xff]   ;;  %v585_v55 = vld [vmem:[#allocation12 + $0x30] sm:$0xff]   ;;  %v193_v58 = vsub.s32 0, %v192_v57  ;;  %v197_v6 = vsub.s32 1, %v192_v57  ;;  %s749_s16 = scalar_lea.vmem %s470_s0, 256  ;;  %p754_p1 = scmp.lt.s32.totalorder %s470_s0, %s470_s0 }
  0x8a   :  { %v586_v56 = vld [vmem:[#allocation12 + $0x38] sm:$0xff]   ;;  %p750_p0 = scmp.ne.s32.totalorder %s470_s0, %s749_s16  ;;  %p755_p2 = scmp.lt.s32.totalorder %s749_s16, %s749_s16 }
  0x8b   :  { %286 = vmatpush1.bf16.msra.mxu0 %v563_v19  ;;  %v189_v59 = vld [vmem:[#allocation11] sm:$0x3] }
  0x8c   :  { %287 = vmatprep.subr.bf16.mxu0 %v564_v20  ;;  %523 = vmatpush3.bf16.msra.mxu1 %v580_v33  ;;  %v194_v60 = vrot.slane %v189_v59, %v193_v58  ;;  %p756_p3 = por %p755_p2, %p754_p1 }
  0x8d   :  { %524 = vmatprep.subr.bf16.mxu1 %v793_v32 }
  0x8e   :  { %p757_p4 = pnand %p756_p3, %p750_p0 }
  0x8f   :  { %288 = vmatpush1.bf16.msra.mxu0 %v566_v21  ;;  %v510_v21 = vld [vmem:[#allocation14] ss:$0 sm:$0xff] }
  0x90   :  { %289 = vmatprep.subr.bf16.mxu0 %v567_v22  ;;  %525 = vmatpush3.bf16.msra.mxu1 %v581_v51 }
  0x91   :  { %526 = vmatprep.subr.bf16.mxu1 %v793_v32 }
  0x93   :  { %290 = vmatpush1.bf16.msra.mxu0 %v569_v23 }
  0x94   :  { %291 = vmatprep.subr.bf16.mxu0 %v570_v24  ;;  %527 = vmatpush3.bf16.msra.mxu1 %v582_v52 }
  0x95   :  { %528 = vmatprep.subr.bf16.mxu1 %v793_v32 }
  0x97   :  { %292 = vmatpush1.bf16.msra.mxu0 %v572_v26 }
  0x98   :  { %293 = vmatprep.subr.bf16.mxu0 %v573_v27  ;;  %529 = vmatpush3.bf16.msra.mxu1 %v583_v53 }
  0x99   :  { %530 = vmatprep.subr.bf16.mxu1 %v793_v32 }
  0x9b   :  { %294 = vmatpush1.bf16.msra.mxu0 %v575_v28 }
  0x9c   :  { %295 = vmatprep.subr.bf16.mxu0 %v576_v29  ;;  %531 = vmatpush3.bf16.msra.mxu1 %v584_v54 }
  0x9d   :  { %532 = vmatprep.subr.bf16.mxu1 %v793_v32 }
  0x9f   :  { %296 = vmatpush1.bf16.msra.mxu0 %v578_v30 }
  0xa0   :  { %533 = vmatpush3.bf16.msra.mxu1 %v585_v55 }
  0xa1   :  { %534 = vmatprep.subr.bf16.mxu1 %v793_v32 }
  0xa4   :  { %535 = vmatpush3.bf16.msra.mxu1 %v586_v56 }
 0x10e   :  { %v122_v7 = vpop.xlane.xlu0 %121 }
 0x10f   :  { %v125_v8 = vmul.f32 0.03125, %v122_v7  ;;  %v198_v7 = vrot.slane %v189_v59, %v197_v6 }
 0x111   :  { %v127_v9 = vsub.f32 %v119_v0, %v125_v8 }
 0x112   :  { %v124_v10 = vpop.xlane.xlu0 %123 }
 0x113   :  { %v126_v11 = vmul.f32 0.03125, %v124_v10  ;;  %v134_v12 = vsel %vm131_vm0, %v127_v9, 0.0 }
 0x114   :  { %v136_v13 = vmul.f32 %v134_v12, %v134_v12 }
 0x115   :  { %v128_v14 = vsub.f32 %v120_v1, %v126_v11 }
 0x116   :  { %138 = vadd.xlane.f32.xlu1 %v136_v13 }
 0x117   :  { %v135_v15 = vsel %vm131_vm0, %v128_v14, 0.0 }
 0x118   :  { %v137_v16 = vmul.f32 %v135_v15, %v135_v15 }
 0x11a   :  { %140 = vadd.xlane.f32.xlu1 %v137_v16 }
 0x1a3   :  { %v139_v34 = vpop.xlane.xlu1 %138 }
 0x1a4   :  { %v142_v35 = vmul.f32 0.03125, %v139_v34 }
 0x1a6   :  { %v144_v36 = vadd.f32 1e-05, %v142_v35 }
 0x1a7   :  { %v141_v37 = vpop.xlane.xlu1 %140 }
 0x1a8   :  { %587 = vrsqrt.f32 %v144_v36  ;;  %v143_v38 = vmul.f32 0.03125, %v141_v37 }
 0x1aa   :  { %v145_v39 = vadd.f32 1e-05, %v143_v38 }
 0x1ac   :  { %589 = vrsqrt.f32 %v145_v39 }
 0x1b2   :  { %v588_v40 = vpop.eup %587 }
 0x1b3   :  { %v148_v41 = vmul.f32 %v588_v40, %v134_v12 }
 0x1b5   :  { %v157_v45 = vmul.f32 %v484_v42, %v148_v41 }
 0x1b6   :  { %v590_v43 = vpop.eup %589 }
 0x1b7   :  { %v149_v44 = vmul.f32 %v590_v43, %v135_v15  ;;  %v166_v48 = vadd.f32 %v485_v46, %v157_v45 }
 0x1b9   :  { %v158_v47 = vmul.f32 %v484_v42, %v149_v44 }
 0x1bb   :  { %v167_v49 = vadd.f32 %v485_v46, %v158_v47 }
 0x1bd   :  { %v168_v50 = vpack.c.bf16 %v167_v49, %v166_v48 }
 0x1bf   :  { %314 = vmatmul.mubr.bf16.vlgmr.msra.gmra.mrb[0].mxu0 %v168_v50 }
 0x292   :  { %v315_v61 = vpop.f32.mrb[0].mxu0 }
 0x293   :  { %v316_v62 = vadd.f32 %v315_v61, %v194_v60  ;;  %v317_v63 = vpop.f32.mrb[1].mxu0 }
 0x294   :  { %v319_v0 = vpop.f32.mrb[2].mxu0  ;;  %v318_v5 = vadd.f32 %v317_v63, %v198_v7 }
 0x295   :  { %v326_v1 = vmul.f32 0.70710677, %v316_v62  ;;  %v320_v2 = vadd.f32 %v319_v0, %v194_v60  ;;  %v321_v3 = vpop.f32.mrb[3].mxu0  ;;  %v324_v9 = vmul.f32 0.5, %v316_v62 }
 0x296   :  { %v322_v16 = vadd.f32 %v321_v3, %v198_v7 }
 0x297   :  { %591 = verf.f32 %v326_v1  ;;  %v327_v4 = vmul.f32 0.70710677, %v320_v2  ;;  %v325_v13 = vmul.f32 0.5, %v320_v2 }
 0x299   :  { %593 = verf.f32 %v327_v4 }
 0x2a1   :  { %v592_v8 = vpop.eup %591 }
 0x2a2   :  { %v330_v10 = vadd.f32 1.0, %v592_v8 }
 0x2a3   :  { %v594_v11 = vpop.eup %593 }
 0x2a4   :  { %v332_v12 = vmul.f32 %v330_v10, %v324_v9  ;;  %v331_v14 = vadd.f32 1.0, %v594_v11 }
 0x2a6   :  { %v334_v15 = vmul.f32 %v332_v12, %v318_v5  ;;  %v333_v17 = vmul.f32 %v331_v14, %v325_v13 }
 0x2a8   :  { %v335_v18 = vmul.f32 %v333_v17, %v322_v16 }
 0x2aa   :  { %v336_v19 = vpack.c.bf16 %v335_v18, %v334_v15 }
 0x2ac   :  { %537 = vmatmul.mubr.bf16.vlgmr.msra.gmra.mrb[0].mxu1 %v336_v19 }
 0x37f   :  { %v437_v20 = vpop.f32.mrb[0].mxu1 }
 0x380   :  { %v538_v22 = vpop.f32.mrb[1].mxu1  ;;  %v460_v25 = vadd.f32 %v510_v21, %v437_v20 }
 0x381   :  { %v440_v23 = vpop.f32.mrb[2].mxu1 }
 0x382   :  { %v539_v24 = vpop.f32.mrb[3].mxu1  ;;  %v461_v26 = vadd.f32 %v510_v21, %v440_v23  ;;  %462 = vst [vmem:[#allocation15] sm:$0xff] %v460_v25 }
 0x384   :  { %463 = vst [vmem:[#allocation15 + $0x8] sm:$0xff] %v461_v26 }
 0x385   :  { %760 = shalt.err (!%p757_p4)
}
 0x386   :  { %s761_s20 = scalar_lea.hbm %s950_s7, 256 }
 0x387   :  { %p762_p5 = scmp.ne.s32.totalorder %s950_s7, %s761_s20  ;;  %p765_p6 = scmp.lt.u32.totalorder %s761_s20, %s950_s7 }
 0x389   :  { %p767_p7 = pnand %p765_p6, %p762_p5 }
 0x38b   :  { %770 = shalt.err (!%p767_p7)
}
 0x38c   :  { %475 = dma.vmem_to_hbm [thread:$0]  %s470_s0, 256, %s950_s7, [#allocation5], %s784_s25, %s784_s25, %s785_s26  }
 0x38d   :  { %779 = dma.done.wait [#allocation5], 256  }
 0x38e   :  { %780 = vsyncadd [#allocation5], 4294967040 }
 0x38f   :  { %479 = vsyncpa [#allocation4], 1 }
 0x390   :  { %480 = vsyncpa [#allocation7], 1 }
 0x391   :  { %481 = vsyncpa [#allocation10], 1 }
 0x392   :  { %482 = vsyncpa [#allocation13], 1 }
 0x393   :  { %483 = vsyncpa [#allocation5], 1 }

</bundles_post_ra>
